<compile_context>
chip_gen: v6e
topology: v6e:2x2x1
jax: 0.10.0
libtpu: 0.0.40
codegen_flags: <defaults>
</compile_context>

<pallas_src>
import functools
import math

import jax
import jax.numpy as jnp
from jax.experimental import pallas as pl
from jax.experimental.pallas import tpu as pltpu

# ---- small synthetic config (consistent with SigLipVisionConfig semantics) --
B = 2            # batch
S = 8            # seq len (q_len == k_v_seq_len)
D = 32           # hidden_size (embed_dim)
H = 4            # num_attention_heads
HD = D // H      # head_dim
I = 64           # intermediate_size
EPS = 1e-6       # layer_norm_eps
SCALE = HD ** -0.5


def _layer_norm(h, w, b):
    mu = jnp.mean(h, axis=-1, keepdims=True)
    var = jnp.mean((h - mu) ** 2, axis=-1, keepdims=True)
    return (h - mu) * jax.lax.rsqrt(var + EPS) * w + b


def _gelu_tanh(x):
    c = math.sqrt(2.0 / math.pi)
    return 0.5 * x * (1.0 + jnp.tanh(c * (x + 0.044715 * x * x * x)))


def encoder_layer_kernel(x_ref, mask_ref,
                         ln1w_ref, ln1b_ref,
                         wqkv_ref, bqkv_ref, wo_ref, bo_ref,
                         ln2w_ref, ln2b_ref,
                         w1_ref, b1_ref, w2_ref, b2_ref,
                         out_ref, *, num_heads, compute_dtype):
    f32 = jnp.float32
    exact = jnp.dtype(compute_dtype) == jnp.dtype(jnp.float32)
    cast = lambda a: a.astype(compute_dtype)

    x = x_ref[...]                              # (S, D) for this batch element
    mask = mask_ref[...]                        # (S, S) additive mask
    seq, d = x.shape
    head_dim = d // num_heads
    scale = head_dim ** -0.5

    # --- layer_norm1 (fp32) ---
    h = _layer_norm(x, ln1w_ref[...], ln1b_ref[...])                  # (S, D)

    # --- fused QKV projection: one lane-dense (S,D)@(D,3D) MXU matmul --------
    qkv = jnp.dot(cast(h), cast(wqkv_ref[...]),
                  preferred_element_type=f32) + bqkv_ref[...]          # (S, 3D)
    # cast operands ONCE (bias already added); static lane slices below.
    q = cast(qkv[:, 0 * d:1 * d])
    k = cast(qkv[:, 1 * d:2 * d])
    v = cast(qkv[:, 2 * d:3 * d])

    # --- per-head scores / softmax / PV (static loop, heads stay lane-packed)
    heads = []
    for hh in range(num_heads):
        sl = slice(hh * head_dim, (hh + 1) * head_dim)
        s = jnp.einsum('qd,kd->qk', q[:, sl], k[:, sl],
                       preferred_element_type=f32) * scale + mask      # (S, S)
        s = s - jnp.max(s, axis=-1, keepdims=True)                     # f32 softmax
        p = jnp.exp(s)
        l = jnp.sum(p, axis=-1, keepdims=True)
        if exact:
            p = p / l                                                  # exact f32 path
        else:
            p = p * pl.reciprocal(l, approx=True)                      # EUP slot
        # attention_dropout = 0.0 in the config -> dropout is identity.
        heads.append(jnp.einsum('qk,kd->qd', cast(p), v[:, sl],
                                preferred_element_type=f32))           # (S, HD)
    a = jnp.concatenate(heads, axis=-1)                                # (S, D) lane-packed

    # --- out projection: single dense (S,D)@(D,D) matmul ---------------------
    attn = jnp.dot(cast(a), cast(wo_ref[...]),
                   preferred_element_type=f32) + bo_ref[...]           # (S, D)
    h1 = x + attn                                                      # residual 1

    # --- layer_norm2 + MLP (gelu-tanh) ---------------------------------------
    h2 = _layer_norm(h1, ln2w_ref[...], ln2b_ref[...])
    f = jnp.dot(cast(h2), cast(w1_ref[...]),
                preferred_element_type=f32) + b1_ref[...]
    f = _gelu_tanh(f)
    f = jnp.dot(cast(f), cast(w2_ref[...]),
                preferred_element_type=f32) + b2_ref[...]

    out_ref[...] = h1 + f                                              # residual 2
    # TODO(synk): output_attentions=True path (returning attn weights) not implemented.


def siglip_encoder_layer(x, attention_mask, params, *, compute_dtype=jnp.float32):
    """Fused SigLip encoder layer.  x: (B,S,D) f32, attention_mask: (B,1,S,S) additive."""
    (ln1w, ln1b, wq, bq, wk, bk, wv, bv, wo, bo,
     ln2w, ln2b, w1, b1, w2, b2) = params

    batch, seq, d = x.shape
    num_heads = H
    inter = w1.shape[1]

    # Fuse the three projections into a single (D, 3D) weight / (1, 3D) bias in
    # the wrapper (plain XLA, done once per trace) -> one MXU matmul in-kernel.
    wqkv = jnp.concatenate([wq, wk, wv], axis=1)        # (D, 3D)
    bqkv = jnp.concatenate([bq, bk, bv], axis=1)        # (1, 3D)

    # Per-batch additive mask, (B, S, S).  No packed (T,T) mask is built.
    mask3 = attention_mask[:, 0].astype(jnp.float32)

    const2d = lambda shape: pl.BlockSpec(shape, lambda b: (0, 0))       # resident weights

    grid_spec = pltpu.PrefetchScalarGridSpec(
        num_scalar_prefetch=0,
        grid=(batch,),                                   # one step per batch element
        in_specs=[
            pl.BlockSpec((None, seq, d), lambda b: (b, 0, 0)),          # x[b]
            pl.BlockSpec((None, seq, seq), lambda b: (b, 0, 0)),        # mask[b]
            const2d((1, d)), const2d((1, d)),                           # ln1 w/b
            const2d((d, 3 * d)), const2d((1, 3 * d)),                   # fused qkv
            const2d((d, d)), const2d((1, d)),                           # out_proj
            const2d((1, d)), const2d((1, d)),                           # ln2 w/b
            const2d((d, inter)), const2d((1, inter)),                   # fc1
            const2d((inter, d)), const2d((1, d)),                       # fc2
        ],
        out_specs=pl.BlockSpec((None, seq, d), lambda b: (b, 0, 0)),
    )

    out = pl.pallas_call(
        functools.partial(encoder_layer_kernel,
                          num_heads=num_heads, compute_dtype=compute_dtype),
        out_shape=jax.ShapeDtypeStruct((batch, seq, d), jnp.float32),
        grid_spec=grid_spec,
        compiler_params=pltpu.CompilerParams(
            # batch axis is independent -> parallel (feeds both v7x TensorCores)
            dimension_semantics=("parallel",),
            vmem_limit_bytes=32 * 1024 * 1024),
    )(x, mask3, ln1w, ln1b, wqkv, bqkv, wo, bo,
      ln2w, ln2b, w1, b1, w2, b2)

    return out


# ------------------------- pure-JAX reference --------------------------------
def reference(x, mask, params):
    (ln1w, ln1b, wq, bq, wk, bk, wv, bv, wo, bo,
     ln2w, ln2b, w1, b1, w2, b2) = params

    def ln(h, w, b):
        mu = jnp.mean(h, -1, keepdims=True)
        var = jnp.mean((h - mu) ** 2, -1, keepdims=True)
        return (h - mu) / jnp.sqrt(var + EPS) * w[0] + b[0]

    h = ln(x, ln1w, ln1b)
    q = h @ wq + bq[0]
    k = h @ wk + bk[0]
    v = h @ wv + bv[0]
    q = q.reshape(B, S, H, HD).transpose(0, 2, 1, 3)
    k = k.reshape(B, S, H, HD).transpose(0, 2, 1, 3)
    v = v.reshape(B, S, H, HD).transpose(0, 2, 1, 3)
    s = jnp.einsum('bhqd,bhkd->bhqk', q, k) * SCALE + mask
    p = jax.nn.softmax(s.astype(jnp.float32), axis=-1)
    a = jnp.einsum('bhqk,bhkd->bhqd', p, v)
    a = a.transpose(0, 2, 1, 3).reshape(B, S, D)
    a = a @ wo + bo[0]
    h1 = x + a
    h2 = ln(h1, ln2w, ln2b)
    f = h2 @ w1 + b1[0]
    c = math.sqrt(2.0 / math.pi)
    f = 0.5 * f * (1.0 + jnp.tanh(c * (f + 0.044715 * f ** 3)))
    f = f @ w2 + b2[0]
    return h1 + f


if __name__ == "__main__":
    key = jax.random.PRNGKey(0)
    ks = jax.random.split(key, 16)

    x = jax.random.normal(ks[0], (B, S, D), jnp.float32)
    # additive mask (B,1,S,S): mask ~20% of keys with a large negative value
    key_mask = jax.random.bernoulli(ks[13], 0.2, (B, 1, 1, S))
    mask = jnp.where(key_mask, -1e9, 0.0).astype(jnp.float32)
    mask = jnp.broadcast_to(mask, (B, 1, S, S))

    def lin(kw, kb, fan_in, fan_out):
        # deterministic init, weight stored PRE-TRANSPOSED as (in, out)
        w = jax.random.normal(kw, (fan_in, fan_out), jnp.float32) * (1.0 / math.sqrt(fan_in))
        b = jax.random.normal(kb, (1, fan_out), jnp.float32) * 0.01
        return w, b

    ln1w = jnp.ones((1, D), jnp.float32)
    ln1b = jnp.zeros((1, D), jnp.float32)
    ln2w = jnp.ones((1, D), jnp.float32)
    ln2b = jnp.zeros((1, D), jnp.float32)
    wq, bq = lin(ks[1], ks[2], D, D)
    wk, bk = lin(ks[3], ks[4], D, D)
    wv, bv = lin(ks[5], ks[6], D, D)
    wo, bo = lin(ks[7], ks[8], D, D)
    w1, b1 = lin(ks[9], ks[10], D, I)
    w2, b2 = lin(ks[11], ks[12], I, D)

    params = (ln1w, ln1b, wq, bq, wk, bk, wv, bv, wo, bo,
              ln2w, ln2b, w1, b1, w2, b2)

    ref = reference(x, mask, params)

    # f32 MXU path: tight correctness check against the PyTorch-equivalent ref.
    out = jax.block_until_ready(siglip_encoder_layer(x, mask, params))
    assert out.shape == (B, S, D)
    assert jnp.allclose(out, ref, atol=1e-4, rtol=1e-4), "f32 mismatch vs reference"

    # bf16 MXU path (f32 accumulation + approx EUP reciprocal): loose sanity check.
    out_bf16 = jax.block_until_ready(
        siglip_encoder_layer(x, mask, params, compute_dtype=jnp.bfloat16))
    assert jnp.allclose(out_bf16, ref, atol=1e-1, rtol=1e-1), "bf16 mismatch vs reference"

    print("KERNEL_OK")
</pallas_src>

<mosaic_0001>
module attributes {stable_mosaic.version = 11 : i64} {
  func.func @encoder_layer_kernel(%arg0: i32, %arg1: memref<1x8x32xf32, #tpu.memory_space<vmem>>, %arg2: memref<1x8x8xf32, #tpu.memory_space<vmem>>, %arg3: memref<1x32xf32, #tpu.memory_space<vmem>>, %arg4: memref<1x32xf32, #tpu.memory_space<vmem>>, %arg5: memref<32x96xf32, #tpu.memory_space<vmem>>, %arg6: memref<1x96xf32, #tpu.memory_space<vmem>>, %arg7: memref<32x32xf32, #tpu.memory_space<vmem>>, %arg8: memref<1x32xf32, #tpu.memory_space<vmem>>, %arg9: memref<1x32xf32, #tpu.memory_space<vmem>>, %arg10: memref<1x32xf32, #tpu.memory_space<vmem>>, %arg11: memref<32x64xf32, #tpu.memory_space<vmem>>, %arg12: memref<1x64xf32, #tpu.memory_space<vmem>>, %arg13: memref<64x32xf32, #tpu.memory_space<vmem>>, %arg14: memref<1x32xf32, #tpu.memory_space<vmem>>, %arg15: memref<1x8x32xf32, #tpu.memory_space<vmem>>) attributes {dimension_semantics = [#tpu.dimension_semantics<parallel>], iteration_bounds = array<i64: 2>, scalar_prefetch = 0 : i64, scratch_operands = 0 : i64, tpu.core_type = #tpu.core_type<tc>, window_params = [{transform_indices = @transform_0, window_bounds = array<i64: 1, 8, 32>}, {transform_indices = @transform_1, window_bounds = array<i64: 1, 8, 8>}, {pipeline_mode = #tpu.pipeline_mode<synchronous>, transform_indices = @transform_2, window_bounds = array<i64: 1, 32>}, {pipeline_mode = #tpu.pipeline_mode<synchronous>, transform_indices = @transform_3, window_bounds = array<i64: 1, 32>}, {pipeline_mode = #tpu.pipeline_mode<synchronous>, transform_indices = @transform_4, window_bounds = array<i64: 32, 96>}, {pipeline_mode = #tpu.pipeline_mode<synchronous>, transform_indices = @transform_5, window_bounds = array<i64: 1, 96>}, {pipeline_mode = #tpu.pipeline_mode<synchronous>, transform_indices = @transform_6, window_bounds = array<i64: 32, 32>}, {pipeline_mode = #tpu.pipeline_mode<synchronous>, transform_indices = @transform_7, window_bounds = array<i64: 1, 32>}, {pipeline_mode = #tpu.pipeline_mode<synchronous>, transform_indices = @transform_8, window_bounds = array<i64: 1, 32>}, {pipeline_mode = #tpu.pipeline_mode<synchronous>, transform_indices = @transform_9, window_bounds = array<i64: 1, 32>}, {pipeline_mode = #tpu.pipeline_mode<synchronous>, transform_indices = @transform_10, window_bounds = array<i64: 32, 64>}, {pipeline_mode = #tpu.pipeline_mode<synchronous>, transform_indices = @transform_11, window_bounds = array<i64: 1, 64>}, {pipeline_mode = #tpu.pipeline_mode<synchronous>, transform_indices = @transform_12, window_bounds = array<i64: 64, 32>}, {pipeline_mode = #tpu.pipeline_mode<synchronous>, transform_indices = @transform_13, window_bounds = array<i64: 1, 32>}, {transform_indices = @transform_14, window_bounds = array<i64: 1, 8, 32>}]} {
    %c0 = arith.constant 0 : index
    %c0_0 = arith.constant 0 : index
    %c0_1 = arith.constant 0 : index
    %0 = vector.load %arg1[%c0, %c0_0, %c0_1] : memref<1x8x32xf32, #tpu.memory_space<vmem>>, vector<1x8x32xf32>
    %1 = vector.shape_cast %0 : vector<1x8x32xf32> to vector<8x32xf32>
    %c0_2 = arith.constant 0 : index
    %c0_3 = arith.constant 0 : index
    %c0_4 = arith.constant 0 : index
    %2 = vector.load %arg2[%c0_2, %c0_3, %c0_4] : memref<1x8x8xf32, #tpu.memory_space<vmem>>, vector<1x8x8xf32>
    %3 = vector.shape_cast %2 : vector<1x8x8xf32> to vector<8x8xf32>
    %c0_5 = arith.constant 0 : index
    %c0_6 = arith.constant 0 : index
    %4 = vector.load %arg3[%c0_5, %c0_6] : memref<1x32xf32, #tpu.memory_space<vmem>>, vector<1x32xf32>
    %c0_7 = arith.constant 0 : index
    %c0_8 = arith.constant 0 : index
    %5 = vector.load %arg4[%c0_7, %c0_8] : memref<1x32xf32, #tpu.memory_space<vmem>>, vector<1x32xf32>
    %cst = arith.constant dense<0.000000e+00> : vector<8xf32>
    %6 = vector.multi_reduction <add>, %1, %cst [1] : vector<8x32xf32> to vector<8xf32>
    %7 = vector.shape_cast %6 : vector<8xf32> to vector<8x1xf32>
    %cst_9 = arith.constant 3.200000e+01 : f32
    %8 = vector.broadcast %cst_9 : f32 to vector<8x1xf32>
    %9 = arith.divf %7, %8 : vector<8x1xf32>
    %10 = vector.broadcast %9 : vector<8x1xf32> to vector<8x32xf32>
    %11 = arith.subf %1, %10 : vector<8x32xf32>
    %12 = arith.mulf %11, %11 : vector<8x32xf32>
    %cst_10 = arith.constant dense<0.000000e+00> : vector<8xf32>
    %13 = vector.multi_reduction <add>, %12, %cst_10 [1] : vector<8x32xf32> to vector<8xf32>
    %14 = vector.shape_cast %13 : vector<8xf32> to vector<8x1xf32>
    %cst_11 = arith.constant 3.200000e+01 : f32
    %15 = vector.broadcast %cst_11 : f32 to vector<8x1xf32>
    %16 = arith.divf %14, %15 : vector<8x1xf32>
    %17 = vector.broadcast %9 : vector<8x1xf32> to vector<8x32xf32>
    %18 = arith.subf %1, %17 : vector<8x32xf32>
    %cst_12 = arith.constant 9.99999997E-7 : f32
    %19 = vector.broadcast %cst_12 : f32 to vector<8x1xf32>
    %20 = arith.addf %16, %19 : vector<8x1xf32>
    %21 = math.rsqrt %20 : vector<8x1xf32>
    %22 = vector.broadcast %21 : vector<8x1xf32> to vector<8x32xf32>
    %23 = arith.mulf %18, %22 : vector<8x32xf32>
    %24 = vector.broadcast %4 : vector<1x32xf32> to vector<8x32xf32>
    %25 = arith.mulf %23, %24 : vector<8x32xf32>
    %26 = vector.broadcast %5 : vector<1x32xf32> to vector<8x32xf32>
    %27 = arith.addf %25, %26 : vector<8x32xf32>
    %c0_13 = arith.constant 0 : index
    %c0_14 = arith.constant 0 : index
    %28 = vector.load %arg5[%c0_13, %c0_14] : memref<32x96xf32, #tpu.memory_space<vmem>>, vector<32x96xf32>
    %cst_15 = arith.constant dense<0.000000e+00> : vector<8x96xf32>
    %29 = tpu.matmul %27, %28, %cst_15 {dimension_numbers = #tpu.dot_dimension_numbers<[1], [0], [0], [1], [0, 0, 1, 1], [], []>} : vector<8x32xf32>, vector<32x96xf32>, vector<8x96xf32> -> vector<8x96xf32>
    %c0_16 = arith.constant 0 : index
    %c0_17 = arith.constant 0 : index
    %30 = vector.load %arg6[%c0_16, %c0_17] : memref<1x96xf32, #tpu.memory_space<vmem>>, vector<1x96xf32>
    %31 = vector.broadcast %30 : vector<1x96xf32> to vector<8x96xf32>
    %32 = arith.addf %29, %31 : vector<8x96xf32>
    %33 = vector.extract_strided_slice %32 {offsets = [0, 0], sizes = [8, 32], strides = [1, 1]} : vector<8x96xf32> to vector<8x32xf32>
    %34 = vector.extract_strided_slice %32 {offsets = [0, 32], sizes = [8, 32], strides = [1, 1]} : vector<8x96xf32> to vector<8x32xf32>
    %35 = vector.extract_strided_slice %32 {offsets = [0, 64], sizes = [8, 32], strides = [1, 1]} : vector<8x96xf32> to vector<8x32xf32>
    %36 = vector.extract_strided_slice %33 {offsets = [0, 0], sizes = [8, 8], strides = [1, 1]} : vector<8x32xf32> to vector<8x8xf32>
    %37 = vector.extract_strided_slice %34 {offsets = [0, 0], sizes = [8, 8], strides = [1, 1]} : vector<8x32xf32> to vector<8x8xf32>
    "tpu.trace_start"() <{level = 10 : i32, message = "qd,kd->qk"}> : () -> ()
    %cst_18 = arith.constant dense<0.000000e+00> : vector<8x8xf32>
    %38 = tpu.matmul %36, %37, %cst_18 {dimension_numbers = #tpu.dot_dimension_numbers<[1], [1], [0], [0], [0, 0, 1, 0], [], []>} : vector<8x8xf32>, vector<8x8xf32>, vector<8x8xf32> -> vector<8x8xf32>
    "tpu.trace_stop"() : () -> ()
    %cst_19 = arith.constant 0.353553385 : f32
    %39 = vector.broadcast %cst_19 : f32 to vector<8x8xf32>
    %40 = arith.mulf %38, %39 : vector<8x8xf32>
    %41 = arith.addf %40, %3 : vector<8x8xf32>
    %cst_20 = arith.constant dense<0xFF800000> : vector<8xf32>
    %42 = vector.multi_reduction <maximumf>, %41, %cst_20 [1] : vector<8x8xf32> to vector<8xf32>
    %43 = vector.shape_cast %42 : vector<8xf32> to vector<8x1xf32>
    %44 = vector.broadcast %43 : vector<8x1xf32> to vector<8x8xf32>
    %45 = arith.subf %41, %44 : vector<8x8xf32>
    %46 = math.exp %45 : vector<8x8xf32>
    %cst_21 = arith.constant dense<0.000000e+00> : vector<8xf32>
    %47 = vector.multi_reduction <add>, %46, %cst_21 [1] : vector<8x8xf32> to vector<8xf32>
    %48 = vector.shape_cast %47 : vector<8xf32> to vector<8x1xf32>
    %49 = vector.broadcast %48 : vector<8x1xf32> to vector<8x8xf32>
    %50 = arith.divf %46, %49 : vector<8x8xf32>
    %51 = vector.extract_strided_slice %35 {offsets = [0, 0], sizes = [8, 8], strides = [1, 1]} : vector<8x32xf32> to vector<8x8xf32>
    "tpu.trace_start"() <{level = 10 : i32, message = "qk,kd->qd"}> : () -> ()
    %cst_22 = arith.constant dense<0.000000e+00> : vector<8x8xf32>
    %52 = tpu.matmul %50, %51, %cst_22 {dimension_numbers = #tpu.dot_dimension_numbers<[1], [0], [0], [1], [0, 0, 1, 1], [], []>} : vector<8x8xf32>, vector<8x8xf32>, vector<8x8xf32> -> vector<8x8xf32>
    "tpu.trace_stop"() : () -> ()
    %53 = vector.extract_strided_slice %33 {offsets = [0, 8], sizes = [8, 8], strides = [1, 1]} : vector<8x32xf32> to vector<8x8xf32>
    %54 = vector.extract_strided_slice %34 {offsets = [0, 8], sizes = [8, 8], strides = [1, 1]} : vector<8x32xf32> to vector<8x8xf32>
    "tpu.trace_start"() <{level = 10 : i32, message = "qd,kd->qk"}> : () -> ()
    %cst_23 = arith.constant dense<0.000000e+00> : vector<8x8xf32>
    %55 = tpu.matmul %53, %54, %cst_23 {dimension_numbers = #tpu.dot_dimension_numbers<[1], [1], [0], [0], [0, 0, 1, 0], [], []>} : vector<8x8xf32>, vector<8x8xf32>, vector<8x8xf32> -> vector<8x8xf32>
    "tpu.trace_stop"() : () -> ()
    %cst_24 = arith.constant 0.353553385 : f32
    %56 = vector.broadcast %cst_24 : f32 to vector<8x8xf32>
    %57 = arith.mulf %55, %56 : vector<8x8xf32>
    %58 = arith.addf %57, %3 : vector<8x8xf32>
    %cst_25 = arith.constant dense<0xFF800000> : vector<8xf32>
    %59 = vector.multi_reduction <maximumf>, %58, %cst_25 [1] : vector<8x8xf32> to vector<8xf32>
    %60 = vector.shape_cast %59 : vector<8xf32> to vector<8x1xf32>
    %61 = vector.broadcast %60 : vector<8x1xf32> to vector<8x8xf32>
    %62 = arith.subf %58, %61 : vector<8x8xf32>
    %63 = math.exp %62 : vector<8x8xf32>
    %cst_26 = arith.constant dense<0.000000e+00> : vector<8xf32>
    %64 = vector.multi_reduction <add>, %63, %cst_26 [1] : vector<8x8xf32> to vector<8xf32>
    %65 = vector.shape_cast %64 : vector<8xf32> to vector<8x1xf32>
    %66 = vector.broadcast %65 : vector<8x1xf32> to vector<8x8xf32>
    %67 = arith.divf %63, %66 : vector<8x8xf32>
    %68 = vector.extract_strided_slice %35 {offsets = [0, 8], sizes = [8, 8], strides = [1, 1]} : vector<8x32xf32> to vector<8x8xf32>
    "tpu.trace_start"() <{level = 10 : i32, message = "qk,kd->qd"}> : () -> ()
    %cst_27 = arith.constant dense<0.000000e+00> : vector<8x8xf32>
    %69 = tpu.matmul %67, %68, %cst_27 {dimension_numbers = #tpu.dot_dimension_numbers<[1], [0], [0], [1], [0, 0, 1, 1], [], []>} : vector<8x8xf32>, vector<8x8xf32>, vector<8x8xf32> -> vector<8x8xf32>
    "tpu.trace_stop"() : () -> ()
    %70 = vector.extract_strided_slice %33 {offsets = [0, 16], sizes = [8, 8], strides = [1, 1]} : vector<8x32xf32> to vector<8x8xf32>
    %71 = vector.extract_strided_slice %34 {offsets = [0, 16], sizes = [8, 8], strides = [1, 1]} : vector<8x32xf32> to vector<8x8xf32>
    "tpu.trace_start"() <{level = 10 : i32, message = "qd,kd->qk"}> : () -> ()
    %cst_28 = arith.constant dense<0.000000e+00> : vector<8x8xf32>
    %72 = tpu.matmul %70, %71, %cst_28 {dimension_numbers = #tpu.dot_dimension_numbers<[1], [1], [0], [0], [0, 0, 1, 0], [], []>} : vector<8x8xf32>, vector<8x8xf32>, vector<8x8xf32> -> vector<8x8xf32>
    "tpu.trace_stop"() : () -> ()
    %cst_29 = arith.constant 0.353553385 : f32
    %73 = vector.broadcast %cst_29 : f32 to vector<8x8xf32>
    %74 = arith.mulf %72, %73 : vector<8x8xf32>
    %75 = arith.addf %74, %3 : vector<8x8xf32>
    %cst_30 = arith.constant dense<0xFF800000> : vector<8xf32>
    %76 = vector.multi_reduction <maximumf>, %75, %cst_30 [1] : vector<8x8xf32> to vector<8xf32>
    %77 = vector.shape_cast %76 : vector<8xf32> to vector<8x1xf32>
    %78 = vector.broadcast %77 : vector<8x1xf32> to vector<8x8xf32>
    %79 = arith.subf %75, %78 : vector<8x8xf32>
    %80 = math.exp %79 : vector<8x8xf32>
    %cst_31 = arith.constant dense<0.000000e+00> : vector<8xf32>
    %81 = vector.multi_reduction <add>, %80, %cst_31 [1] : vector<8x8xf32> to vector<8xf32>
    %82 = vector.shape_cast %81 : vector<8xf32> to vector<8x1xf32>
    %83 = vector.broadcast %82 : vector<8x1xf32> to vector<8x8xf32>
    %84 = arith.divf %80, %83 : vector<8x8xf32>
    %85 = vector.extract_strided_slice %35 {offsets = [0, 16], sizes = [8, 8], strides = [1, 1]} : vector<8x32xf32> to vector<8x8xf32>
    "tpu.trace_start"() <{level = 10 : i32, message = "qk,kd->qd"}> : () -> ()
    %cst_32 = arith.constant dense<0.000000e+00> : vector<8x8xf32>
    %86 = tpu.matmul %84, %85, %cst_32 {dimension_numbers = #tpu.dot_dimension_numbers<[1], [0], [0], [1], [0, 0, 1, 1], [], []>} : vector<8x8xf32>, vector<8x8xf32>, vector<8x8xf32> -> vector<8x8xf32>
    "tpu.trace_stop"() : () -> ()
    %87 = vector.extract_strided_slice %33 {offsets = [0, 24], sizes = [8, 8], strides = [1, 1]} : vector<8x32xf32> to vector<8x8xf32>
    %88 = vector.extract_strided_slice %34 {offsets = [0, 24], sizes = [8, 8], strides = [1, 1]} : vector<8x32xf32> to vector<8x8xf32>
    "tpu.trace_start"() <{level = 10 : i32, message = "qd,kd->qk"}> : () -> ()
    %cst_33 = arith.constant dense<0.000000e+00> : vector<8x8xf32>
    %89 = tpu.matmul %87, %88, %cst_33 {dimension_numbers = #tpu.dot_dimension_numbers<[1], [1], [0], [0], [0, 0, 1, 0], [], []>} : vector<8x8xf32>, vector<8x8xf32>, vector<8x8xf32> -> vector<8x8xf32>
    "tpu.trace_stop"() : () -> ()
    %cst_34 = arith.constant 0.353553385 : f32
    %90 = vector.broadcast %cst_34 : f32 to vector<8x8xf32>
    %91 = arith.mulf %89, %90 : vector<8x8xf32>
    %92 = arith.addf %91, %3 : vector<8x8xf32>
    %cst_35 = arith.constant dense<0xFF800000> : vector<8xf32>
    %93 = vector.multi_reduction <maximumf>, %92, %cst_35 [1] : vector<8x8xf32> to vector<8xf32>
    %94 = vector.shape_cast %93 : vector<8xf32> to vector<8x1xf32>
    %95 = vector.broadcast %94 : vector<8x1xf32> to vector<8x8xf32>
    %96 = arith.subf %92, %95 : vector<8x8xf32>
    %97 = math.exp %96 : vector<8x8xf32>
    %cst_36 = arith.constant dense<0.000000e+00> : vector<8xf32>
    %98 = vector.multi_reduction <add>, %97, %cst_36 [1] : vector<8x8xf32> to vector<8xf32>
    %99 = vector.shape_cast %98 : vector<8xf32> to vector<8x1xf32>
    %100 = vector.broadcast %99 : vector<8x1xf32> to vector<8x8xf32>
    %101 = arith.divf %97, %100 : vector<8x8xf32>
    %102 = vector.extract_strided_slice %35 {offsets = [0, 24], sizes = [8, 8], strides = [1, 1]} : vector<8x32xf32> to vector<8x8xf32>
    "tpu.trace_start"() <{level = 10 : i32, message = "qk,kd->qd"}> : () -> ()
    %cst_37 = arith.constant dense<0.000000e+00> : vector<8x8xf32>
    %103 = tpu.matmul %101, %102, %cst_37 {dimension_numbers = #tpu.dot_dimension_numbers<[1], [0], [0], [1], [0, 0, 1, 1], [], []>} : vector<8x8xf32>, vector<8x8xf32>, vector<8x8xf32> -> vector<8x8xf32>
    "tpu.trace_stop"() : () -> ()
    %104 = tpu.concatenate %52, %69, %86, %103 in 1 : vector<8x8xf32>, vector<8x8xf32>, vector<8x8xf32>, vector<8x8xf32> -> vector<8x32xf32>
    %c0_38 = arith.constant 0 : index
    %c0_39 = arith.constant 0 : index
    %105 = vector.load %arg7[%c0_38, %c0_39] : memref<32x32xf32, #tpu.memory_space<vmem>>, vector<32x32xf32>
    %cst_40 = arith.constant dense<0.000000e+00> : vector<8x32xf32>
    %106 = tpu.matmul %104, %105, %cst_40 {dimension_numbers = #tpu.dot_dimension_numbers<[1], [0], [0], [1], [0, 0, 1, 1], [], []>} : vector<8x32xf32>, vector<32x32xf32>, vector<8x32xf32> -> vector<8x32xf32>
    %c0_41 = arith.constant 0 : index
    %c0_42 = arith.constant 0 : index
    %107 = vector.load %arg8[%c0_41, %c0_42] : memref<1x32xf32, #tpu.memory_space<vmem>>, vector<1x32xf32>
    %108 = vector.broadcast %107 : vector<1x32xf32> to vector<8x32xf32>
    %109 = arith.addf %106, %108 : vector<8x32xf32>
    %110 = arith.addf %1, %109 : vector<8x32xf32>
    %c0_43 = arith.constant 0 : index
    %c0_44 = arith.constant 0 : index
    %111 = vector.load %arg9[%c0_43, %c0_44] : memref<1x32xf32, #tpu.memory_space<vmem>>, vector<1x32xf32>
    %c0_45 = arith.constant 0 : index
    %c0_46 = arith.constant 0 : index
    %112 = vector.load %arg10[%c0_45, %c0_46] : memref<1x32xf32, #tpu.memory_space<vmem>>, vector<1x32xf32>
    %cst_47 = arith.constant dense<0.000000e+00> : vector<8xf32>
    %113 = vector.multi_reduction <add>, %110, %cst_47 [1] : vector<8x32xf32> to vector<8xf32>
    %114 = vector.shape_cast %113 : vector<8xf32> to vector<8x1xf32>
    %cst_48 = arith.constant 3.200000e+01 : f32
    %115 = vector.broadcast %cst_48 : f32 to vector<8x1xf32>
    %116 = arith.divf %114, %115 : vector<8x1xf32>
    %117 = vector.broadcast %116 : vector<8x1xf32> to vector<8x32xf32>
    %118 = arith.subf %110, %117 : vector<8x32xf32>
    %119 = arith.mulf %118, %118 : vector<8x32xf32>
    %cst_49 = arith.constant dense<0.000000e+00> : vector<8xf32>
    %120 = vector.multi_reduction <add>, %119, %cst_49 [1] : vector<8x32xf32> to vector<8xf32>
    %121 = vector.shape_cast %120 : vector<8xf32> to vector<8x1xf32>
    %cst_50 = arith.constant 3.200000e+01 : f32
    %122 = vector.broadcast %cst_50 : f32 to vector<8x1xf32>
    %123 = arith.divf %121, %122 : vector<8x1xf32>
    %124 = vector.broadcast %116 : vector<8x1xf32> to vector<8x32xf32>
    %125 = arith.subf %110, %124 : vector<8x32xf32>
    %cst_51 = arith.constant 9.99999997E-7 : f32
    %126 = vector.broadcast %cst_51 : f32 to vector<8x1xf32>
    %127 = arith.addf %123, %126 : vector<8x1xf32>
    %128 = math.rsqrt %127 : vector<8x1xf32>
    %129 = vector.broadcast %128 : vector<8x1xf32> to vector<8x32xf32>
    %130 = arith.mulf %125, %129 : vector<8x32xf32>
    %131 = vector.broadcast %111 : vector<1x32xf32> to vector<8x32xf32>
    %132 = arith.mulf %130, %131 : vector<8x32xf32>
    %133 = vector.broadcast %112 : vector<1x32xf32> to vector<8x32xf32>
    %134 = arith.addf %132, %133 : vector<8x32xf32>
    %c0_52 = arith.constant 0 : index
    %c0_53 = arith.constant 0 : index
    %135 = vector.load %arg11[%c0_52, %c0_53] : memref<32x64xf32, #tpu.memory_space<vmem>>, vector<32x64xf32>
    %cst_54 = arith.constant dense<0.000000e+00> : vector<8x64xf32>
    %136 = tpu.matmul %134, %135, %cst_54 {dimension_numbers = #tpu.dot_dimension_numbers<[1], [0], [0], [1], [0, 0, 1, 1], [], []>} : vector<8x32xf32>, vector<32x64xf32>, vector<8x64xf32> -> vector<8x64xf32>
    %c0_55 = arith.constant 0 : index
    %c0_56 = arith.constant 0 : index
    %137 = vector.load %arg12[%c0_55, %c0_56] : memref<1x64xf32, #tpu.memory_space<vmem>>, vector<1x64xf32>
    %138 = vector.broadcast %137 : vector<1x64xf32> to vector<8x64xf32>
    %139 = arith.addf %136, %138 : vector<8x64xf32>
    %cst_57 = arith.constant 5.000000e-01 : f32
    %140 = vector.broadcast %cst_57 : f32 to vector<8x64xf32>
    %141 = arith.mulf %140, %139 : vector<8x64xf32>
    %cst_58 = arith.constant 4.471500e-02 : f32
    %142 = vector.broadcast %cst_58 : f32 to vector<8x64xf32>
    %143 = arith.mulf %142, %139 : vector<8x64xf32>
    %144 = arith.mulf %143, %139 : vector<8x64xf32>
    %145 = arith.mulf %144, %139 : vector<8x64xf32>
    %146 = arith.addf %139, %145 : vector<8x64xf32>
    %cst_59 = arith.constant 0.797884583 : f32
    %147 = vector.broadcast %cst_59 : f32 to vector<8x64xf32>
    %148 = arith.mulf %147, %146 : vector<8x64xf32>
    %149 = math.tanh %148 : vector<8x64xf32>
    %cst_60 = arith.constant 1.000000e+00 : f32
    %150 = vector.broadcast %cst_60 : f32 to vector<8x64xf32>
    %151 = arith.addf %150, %149 : vector<8x64xf32>
    %152 = arith.mulf %141, %151 : vector<8x64xf32>
    %c0_61 = arith.constant 0 : index
    %c0_62 = arith.constant 0 : index
    %153 = vector.load %arg13[%c0_61, %c0_62] : memref<64x32xf32, #tpu.memory_space<vmem>>, vector<64x32xf32>
    %cst_63 = arith.constant dense<0.000000e+00> : vector<8x32xf32>
    %154 = tpu.matmul %152, %153, %cst_63 {dimension_numbers = #tpu.dot_dimension_numbers<[1], [0], [0], [1], [0, 0, 1, 1], [], []>} : vector<8x64xf32>, vector<64x32xf32>, vector<8x32xf32> -> vector<8x32xf32>
    %c0_64 = arith.constant 0 : index
    %c0_65 = arith.constant 0 : index
    %155 = vector.load %arg14[%c0_64, %c0_65] : memref<1x32xf32, #tpu.memory_space<vmem>>, vector<1x32xf32>
    %156 = vector.broadcast %155 : vector<1x32xf32> to vector<8x32xf32>
    %157 = arith.addf %154, %156 : vector<8x32xf32>
    %158 = arith.addf %110, %157 : vector<8x32xf32>
    %c0_66 = arith.constant 0 : index
    %c0_67 = arith.constant 0 : index
    %c0_68 = arith.constant 0 : index
    %159 = vector.load %arg15[%c0_66, %c0_67, %c0_68] : memref<1x8x32xf32, #tpu.memory_space<vmem>>, vector<1x8x32xf32>
    %160 = vector.shape_cast %159 : vector<1x8x32xf32> to vector<8x32xf32>
    %161 = vector.shape_cast %158 : vector<8x32xf32> to vector<1x8x32xf32>
    tpu.vector_store %arg15[%c0_66, %c0_67, %c0_68], %161 {strides = array<i32>} : memref<1x8x32xf32, #tpu.memory_space<vmem>>, vector<1x8x32xf32>,
    return
  }
  func.func @transform_0(%arg0: i32) -> (i32, i32, i32) {
    %c0_i32 = arith.constant 0 : i32
    %c0_i32_0 = arith.constant 0 : i32
    %c0_i32_1 = arith.constant 0 : i32
    return %arg0, %c0_i32, %c0_i32_0 : i32, i32, i32
  }
  func.func @transform_1(%arg0: i32) -> (i32, i32, i32) {
    %c0_i32 = arith.constant 0 : i32
    %c0_i32_0 = arith.constant 0 : i32
    %c0_i32_1 = arith.constant 0 : i32
    return %arg0, %c0_i32, %c0_i32_0 : i32, i32, i32
  }
  func.func @transform_2(%arg0: i32) -> (i32, i32) {
    %c0_i32 = arith.constant 0 : i32
    %c0_i32_0 = arith.constant 0 : i32
    %c0_i32_1 = arith.constant 0 : i32
    return %c0_i32, %c0_i32_0 : i32, i32
  }
  func.func @transform_3(%arg0: i32) -> (i32, i32) {
    %c0_i32 = arith.constant 0 : i32
    %c0_i32_0 = arith.constant 0 : i32
    %c0_i32_1 = arith.constant 0 : i32
    return %c0_i32, %c0_i32_0 : i32, i32
  }
  func.func @transform_4(%arg0: i32) -> (i32, i32) {
    %c0_i32 = arith.constant 0 : i32
    %c0_i32_0 = arith.constant 0 : i32
    %c0_i32_1 = arith.constant 0 : i32
    return %c0_i32, %c0_i32_0 : i32, i32
  }
  func.func @transform_5(%arg0: i32) -> (i32, i32) {
    %c0_i32 = arith.constant 0 : i32
    %c0_i32_0 = arith.constant 0 : i32
    %c0_i32_1 = arith.constant 0 : i32
    return %c0_i32, %c0_i32_0 : i32, i32
  }
  func.func @transform_6(%arg0: i32) -> (i32, i32) {
    %c0_i32 = arith.constant 0 : i32
    %c0_i32_0 = arith.constant 0 : i32
    %c0_i32_1 = arith.constant 0 : i32
    return %c0_i32, %c0_i32_0 : i32, i32
  }
  func.func @transform_7(%arg0: i32) -> (i32, i32) {
    %c0_i32 = arith.constant 0 : i32
    %c0_i32_0 = arith.constant 0 : i32
    %c0_i32_1 = arith.constant 0 : i32
    return %c0_i32, %c0_i32_0 : i32, i32
  }
  func.func @transform_8(%arg0: i32) -> (i32, i32) {
    %c0_i32 = arith.constant 0 : i32
    %c0_i32_0 = arith.constant 0 : i32
    %c0_i32_1 = arith.constant 0 : i32
    return %c0_i32, %c0_i32_0 : i32, i32
  }
  func.func @transform_9(%arg0: i32) -> (i32, i32) {
    %c0_i32 = arith.constant 0 : i32
    %c0_i32_0 = arith.constant 0 : i32
    %c0_i32_1 = arith.constant 0 : i32
    return %c0_i32, %c0_i32_0 : i32, i32
  }
  func.func @transform_10(%arg0: i32) -> (i32, i32) {
    %c0_i32 = arith.constant 0 : i32
    %c0_i32_0 = arith.constant 0 : i32
    %c0_i32_1 = arith.constant 0 : i32
    return %c0_i32, %c0_i32_0 : i32, i32
  }
  func.func @transform_11(%arg0: i32) -> (i32, i32) {
    %c0_i32 = arith.constant 0 : i32
    %c0_i32_0 = arith.constant 0 : i32
    %c0_i32_1 = arith.constant 0 : i32
    return %c0_i32, %c0_i32_0 : i32, i32
  }
  func.func @transform_12(%arg0: i32) -> (i32, i32) {
    %c0_i32 = arith.constant 0 : i32
    %c0_i32_0 = arith.constant 0 : i32
    %c0_i32_1 = arith.constant 0 : i32
    return %c0_i32, %c0_i32_0 : i32, i32
  }
  func.func @transform_13(%arg0: i32) -> (i32, i32) {
    %c0_i32 = arith.constant 0 : i32
    %c0_i32_0 = arith.constant 0 : i32
    %c0_i32_1 = arith.constant 0 : i32
    return %c0_i32, %c0_i32_0 : i32, i32
  }
  func.func @transform_14(%arg0: i32) -> (i32, i32, i32) {
    %c0_i32 = arith.constant 0 : i32
    %c0_i32_0 = arith.constant 0 : i32
    %c0_i32_1 = arith.constant 0 : i32
    return %arg0, %c0_i32, %c0_i32_0 : i32, i32, i32
  }
}

</mosaic_0001>

<bundles_post_ra>
// kernel: tpu_custom_call.1
= control target key start
LH: loop header
LB: loop body
LE: loop exit
PB: predicated region body
PF: predicated region fallthrough
CT: control target
= control target key end

     0   :  { %s2597_s0 = inlined_call_operand.hbm [shape: f32[2,8,32], index: 0, kind: input, shape index: {}]   ;;  %s2598_s1 = inlined_call_operand.hbm [shape: f32[2,8,8], index: 1, kind: input, shape index: {}]   ;;  %s2599_s2 = inlined_call_operand.vmem [shape: f32[1,32], index: 2, kind: input, shape index: {}]   ;;  %s2600_s3 = inlined_call_operand.vmem [shape: f32[1,32], index: 3, kind: input, shape index: {}]   ;;  %s2601_s4 = inlined_call_operand.vmem [shape: f32[32,96], index: 4, kind: input, shape index: {}]   ;;  %s2602_s5 = inlined_call_operand.vmem [shape: f32[1,96], index: 5, kind: input, shape index: {}]   ;;  %s2603_s6 = inlined_call_operand.vmem [shape: f32[32,32], index: 6, kind: input, shape index: {}]   ;;  %s2604_s7 = inlined_call_operand.vmem [shape: f32[1,32], index: 7, kind: input, shape index: {}]   ;;  %s2605_s8 = inlined_call_operand.vmem [shape: f32[1,32], index: 8, kind: input, shape index: {}]   ;;  %s2606_s9 = inlined_call_operand.vmem [shape: f32[1,32], index: 9, kind: input, shape index: {}]   ;;  %s2607_s10 = inlined_call_operand.vmem [shape: f32[32,64], index: 10, kind: input, shape index: {}]   ;;  %s2608_s11 = inlined_call_operand.vmem [shape: f32[1,64], index: 11, kind: input, shape index: {}]   ;;  %s2609_s12 = inlined_call_operand.vmem [shape: f32[64,32], index: 12, kind: input, shape index: {}]   ;;  %s2610_s13 = inlined_call_operand.vmem [shape: f32[1,32], index: 13, kind: input, shape index: {}]   ;;  %s2611_s14 = inlined_call_operand.hbm [shape: f32[2,8,32], index: 14, kind: output, shape index: {}]  }
   0x1   :  { %2622 = sst [smem:[#allocation16_spill]] %s2597_s0 }
   0x2   :  { %2623 = sst [smem:[#allocation17_spill]] %s2610_s13 }
   0x3   :  { %2624 = sst [smem:[#allocation18_spill]] %s2611_s14 }
   0x4   :  { %19 = vsyncpa [#allocation3], 0 }
   0x5   :  { %21 = vsyncpa [#allocation3 + $0x1], 0 }
   0x6   :  { %22 = vsyncpa [#allocation6], 0 }
   0x7   :  { %24 = vsyncpa [#allocation6 + $0x1], 0 }
   0x8   :  { %25 = vsyncpa [#allocation4], 0 }
   0x9   :  { %27 = vsyncpa [#allocation4 + $0x1], 0  ;;  %s2207_s29 = smov 0   ;;  %s2209_s30 = smov 0  }
   0xa   :  { %s2211_s15 = smov 0   ;;  %s2213_s16 = smov 0  }
   0xb LB: > { %2625 = sst [smem:[#allocation11_spill]] %s2099_s29  ;;  %s2228_s17 = sadd.s32 4294967295, %s2111_s16   ;;  %s2111_s16 = sphi %s2213_s16, %s2651_s16   ;;  %s2107_s15 = sphi %s2211_s15, %s2653_s15   ;;  %s2103_s30 = sphi %s2209_s30, %s2655_s30   ;;  %s2099_s29 = sphi %s2207_s29, %s2654_s29  }
   0xc   : > { %2626 = sst [smem:[#allocation12_spill]] %s2107_s15  ;;  %s1727_s18 = sadd.s32 4294967294, %s2111_s16  }
   0xd   : > { %s2232_s19 = sadd.s32 1, %s2111_s16   ;;  %s40_s20 = sadd.s32 1, %s2107_s15 }
   0xe   : > { %2627 = sst [smem:[#allocation13_spill]] %s2232_s19  ;;  %s37_s21 = ssub.s32 %s2111_s16, %s2232_s19 }
   0xf   : > { %p47_p0 = scmp.ne.s32.totalorder %s2107_s15, %s2103_s30  ;;  %p38_p1 = scmp.eq.s32.totalorder %s37_s21, 0 }
  0x10   : > { %p48_p2 = scmp.eq.s32.totalorder %s2111_s16, 0  ;;  %p53_p3 = scmp.ne.s32.totalorder %s2103_s30, %s2099_s29 }
  0x11   : > { %p54_p4 = scmp.eq.s32.totalorder %s2228_s17, 0  ;;  %p355_p7 = scmp.eq.s32.totalorder %s2228_s17, 1 }
  0x12   : > { %s2244_s22 = scalar_select %p38_p1, %s2107_s15, %s40_s20  }
  0x13   : > { %p2246_p5 = por %p48_p2, %p47_p0  ;;  %p2250_p6 = por %p54_p4, %p53_p3 }
  0x14   : > { %2628 = sst [smem:[#allocation14_spill]] %s2244_s22  ;;  %p361_p8 = scmp.eq.s32.totalorder %s1727_s18, 1 }
  0x15   : > { %s2630_s24 = scalar_select %p2250_p6, 1, 0 }
  0x16   : > { %p1915_p10 = scmp.lt.s32.totalorder %s2111_s16, 2  ;;  %p2257_p11 = por %p355_p7, %p47_p0 }
  0x17   : > { %p2261_p12 = por %p361_p8, %p53_p3  ;;  %s2266_s27 = sand.u32 1, %s2107_s15  }
  0x18   : > { %s2631_s25 = scalar_select %p2257_p11, 1, 0 }
  0x19   : > { %s2632_s26 = scalar_select %p2261_p12, 1, 0 }
  0x1a   : > { %s2617_s28 = sshll.u32 %s2111_s16, 7  ;;  %s2616_s20 = sshll.u32 %s2266_s27, 3 }
  0x1b   : > { %2633 = sst [smem:[#allocation15_spill]] %s2632_s26  ;;  %s421_s19 = scalar_lea.vmem [#allocation2], %s2616_s20 }
  0x1c   : > { %s2634_s0 = sld [smem:[#allocation16_spill]]  ;;  %s428_s29 = sshll.u32 %s421_s19, 4  ;;  %s2285_s29 = int_to_ptr.vmem [resolvable:$true] %s428_s29 }
  0x1d   : > { %p2281_p13 = pnand %p1915_p10, %p2246_p5  ;;  %s418_s21 = scalar_lea.sflag [#allocation3], %s2266_s27 }
  0x1f   : > { %p1989_p3 = pneg %p2281_p13 }
  0x22   : > { %s2275_s22 = scalar_lea.hbm %s2634_s0, %s2617_s28  ;;  %s1992_s20 = scalar_lea.hbm %s2634_s0, 256 }
  0x23   : > { %s1987_s18 = scalar_lea.hbm %s2275_s22, 128  ;;  %p1993_p5 = scmp.lt.s32.totalorder %s2275_s22, %s2634_s0 }
  0x24   : > { %p1988_p2 = scmp.ne.s32.totalorder %s2275_s22, %s1987_s18  ;;  %p1994_p8 = scmp.lt.s32.totalorder %s1992_s20, %s1987_s18 }
  0x26   : > { %p1990_p4 = pnand %p1989_p3, %p1988_p2  ;;  %p1995_p10 = por %p1994_p8, %p1993_p5 }
  0x28   : > { %p1991_p7 = pneg %p1990_p4 }
  0x2a   : > { %p1996_p9 = pnand %p1995_p10, %p1991_p7 }
  0x2c   : > { %1999 = shalt.err (!%p1996_p9)
}
  0x2d   : > { %s2000_s14 = scalar_lea.vmem %s2285_s29, 128  ;;  %s2113_s19 = smov [#allocation2]  }
  0x2e   : > { %p2001_p0 = scmp.ne.s32.totalorder %s2285_s29, %s2000_s14  ;;  %s2005_s23 = sshll.u32 %s2113_s19, 4  ;;  %s2006_s23 = int_to_ptr.vmem [resolvable:$false] %s2005_s23 }
  0x2f   : > { %s2007_s13 = scalar_lea.vmem %s2006_s23, 256  ;;  %p2008_p1 = scmp.lt.s32.totalorder %s2285_s29, %s2006_s23 }
  0x30   : > { %p2003_p2 = pnand %p2001_p0, %p1989_p3  ;;  %p2009_p12 = scmp.lt.s32.totalorder %s2007_s13, %s2000_s14 }
  0x32   : > { %p2004_p4 = pneg %p2003_p2  ;;  %p2010_p11 = por %p2009_p12, %p2008_p1 }
  0x34   : > { %p2011_p5 = pnand %p2010_p11, %p2004_p4 }
  0x36   : > { %2014 = shalt.err (!%p2011_p5)
}
  0x37   : > { %1907 = dma.hbm_to_vmem [thread:$0]  (!%p2281_p13), %s2275_s22, 128, %s2285_s29, %s418_s21  }
  0x38   : > { %p2636_p9 = scmp.lt.s32.totalorder %s2111_s16, 3  ;;  %p2637_p0 = scmp.ge.s32.totalorder %s2111_s16, 1 }
  0x39   : > { %s2639_s13 = sshll.u32 %s2111_s16, 7  ;;  %s2640_s18 = sshll.u32 %s2266_s27, 3 }
  0x3a   : > { %p2318_p7 = pnand %p2637_p0, %p2636_p9  ;;  %s2327_s20 = scalar_lea.hbm %s2598_s1, %s2639_s13 }
  0x3b   : > { %s439_s19 = scalar_lea.vmem [#allocation5], %s2640_s18  ;;  %s436_s29 = scalar_lea.sflag [#allocation6], %s2266_s27 }
  0x3c   : > { %s2638_s26 = scalar_select %p2318_p7, 1, 0 }
  0x3d   : > { %s446_s23 = sshll.u32 %s439_s19, 4  ;;  %s2015_s22 = scalar_lea.hbm %s2327_s20, 128  ;;  %s447_s23 = int_to_ptr.vmem [resolvable:$true] %s446_s23 }
  0x3e   : > { %p2016_p11 = scmp.ne.s32.totalorder %s2327_s20, %s2015_s22  ;;  %s2020_s14 = scalar_lea.hbm %s2598_s1, 256 }
  0x3f   : > { %p2021_p8 = scmp.lt.s32.totalorder %s2327_s20, %s2598_s1  ;;  %p2022_p10 = scmp.lt.s32.totalorder %s2020_s14, %s2015_s22 }
  0x40   : > { %p2018_p12 = pnand %p2016_p11, %p1989_p3 }
  0x41   : > { %p2023_p2 = por %p2022_p10, %p2021_p8 }
  0x42   : > { %p2019_p1 = pneg %p2018_p12 }
  0x44   : > { %p2024_p4 = pnand %p2023_p2, %p2019_p1 }
  0x46   : > { %2027 = shalt.err (!%p2024_p4)
}
  0x47   : > { %s2028_s18 = scalar_lea.vmem %s447_s23, 128  ;;  %s2114_s27 = smov [#allocation5]  }
  0x48   : > { %p2029_p5 = scmp.ne.s32.totalorder %s447_s23, %s2028_s18  ;;  %s2033_s19 = sshll.u32 %s2114_s27, 4  ;;  %s2034_s19 = int_to_ptr.vmem [resolvable:$false] %s2033_s19 }
  0x49   : > { %s2035_s0 = scalar_lea.vmem %s2034_s19, 256  ;;  %p2036_p11 = scmp.lt.s32.totalorder %s447_s23, %s2034_s19 }
  0x4a   : > { %p2031_p9 = pnand %p2029_p5, %p1989_p3  ;;  %p2037_p12 = scmp.lt.s32.totalorder %s2035_s0, %s2028_s18 }
  0x4c   : > { %p2032_p0 = pneg %p2031_p9  ;;  %p2038_p6 = por %p2037_p12, %p2036_p11 }
  0x4e   : > { %p2039_p7 = pnand %p2038_p6, %p2032_p0 }
  0x50   : > { %2042 = shalt.err (!%p2039_p7)
}
  0x51   : > { %1910 = dma.hbm_to_vmem [thread:$0]  (!%p2281_p13), %s2327_s20, 128, %s447_s23, %s436_s29  }
  0x52   : > { %p2641_p1 = scmp.ne.s32.totalorder %s2638_s26, 0 }
  0x53   : > { %s2353_s22 = sand.u32 (!%p2641_p1), 1, %s2103_s30   ;;  %p2642_p6 = scmp.ne.s32.totalorder (!%p2641_p1), %s2630_s24, 0 }
  0x54   : > { %455 = sbr.rel (%p2641_p1) target bundleno = 2487 (0x9b7), region = 76  ;;  %s2356_s21 = sshll.u32 (!%p2641_p1), %s2353_s22, 3 }
  0x55   : > { %s458_s14 = scalar_lea.sflag (!%p2641_p1), [#allocation3], %s2353_s22  ;;  %s461_s13 = scalar_lea.vmem (!%p2641_p1), [#allocation2], %s2356_s21 }
  0x59   : > { %2086 = dma.done.wait (%p2642_p6), %s458_s14, 128  }
  0x5a   : > { %2088 = vsyncadd (%p2642_p6), %s458_s14, 4294967168  ;;  %s467_s15 = scalar_lea.sflag [#allocation6], %s2353_s22  ;;  %s470_s26 = scalar_lea.vmem [#allocation5], %s2356_s21 }
  0x5b   : > { %2090 = dma.done.wait (%p2642_p6), %s467_s15, 128  }
  0x5c   : > { %2092 = vsyncadd (%p2642_p6), %s467_s15, 4294967168  ;;  %vm524_vm0 = vcmask 261120   ;;  %v2370_v0 = vld [vmem:[%s461_s13] sm:$0xff]  ;;  %v556_v7 = vld [vmem:[%s2601_s4 + $0x18] sm:$0xff]  ;;  %v2115_v8 = vmov 0.0   ;;  %vm2116_vm1 = vmmov 0  }
  0x5d   : > { %v525_v1 = vsel %vm524_vm0, %v2370_v0, 0.0  ;;  %1806 = vmatprep.subr.mxu1 %v2115_v8  ;;  %v555_v9 = vld [vmem:[%s2601_s4 + $0x10] sm:$0xff]  ;;  %1814 = vmatprep.mubr.msk.f32.mxu1 %vm2116_vm1, %v2115_v8  ;;  %v554_v10 = vld [vmem:[%s2601_s4 + $0x8] sm:$0xff]  ;;  %v553_v11 = vld [vmem:[%s2601_s4] sm:$0xff]  ;;  %s2117_s24 = smov 120   ;;  %s2118_s29 = smov 96  }
  0x5e   : > { %526 = vadd.xlane.f32.xlu0 %v525_v1  ;;  %1807 = vmatpush3.msra.mxu1 %v556_v7  ;;  %v1738_v16 = vld [vmem:[%s2599_s2] ss:$0 sm:$0xff]  ;;  %s2119_s28 = smov 88   ;;  %s2120_s18 = smov 80   ;;  %vm640_vm2 = vcmask 64512   ;;  %v521_v33 = vld [vmem:[%s470_s26] sm:$0xff] }
  0x5f   : > { %1827 = vmatprep.subr.mxu0 %v2115_v8  ;;  %1808 = vmatprep.subr.mxu1 %v2115_v8  ;;  %v1739_v18 = vld [vmem:[%s2600_s3] ss:$0 sm:$0xff]  ;;  %s2121_s27 = smov 112   ;;  %s2122_s19 = smov 72   ;;  %vm1318_vm3 = vcmask 130048   ;;  %vm1320_vm4 = vcmask 195584  }
  0x60   : > { %1829 = vmatprep.mubr.msk.f32.mxu0 %vm2116_vm1, %v2115_v8  ;;  %1809 = vmatpush3.msra.mxu1 %v555_v9  ;;  %v1740_v21 = vld [vmem:[%s2602_s5] ss:$0 sm:$0xff]  ;;  %s2123_s0 = smov 104   ;;  %s2124_s26 = smov 64   ;;  %vm1544_vm5 = vcmask 523264  }
  0x61   : > { %1810 = vmatprep.subr.mxu1 %v2115_v8  ;;  %s2125_s14 = smov 48   ;;  %s2126_s13 = smov 40  }
  0x62   : > { %1811 = vmatpush3.msra.mxu1 %v554_v10  ;;  %s2127_s15 = smov 56   ;;  %p2646_p3 = scmp.ne.s32.totalorder %s2631_s25, 0 }
  0x63   : > { %1812 = vmatprep.subr.mxu1 %v2115_v8 }
  0x64   : > { %1813 = vmatpush3.msra.mxu1 %v553_v11 }
  0x65   : > { %1817 = vmatprep.subr.mxu1 %v2115_v8 }
  0xe7   : > { %v527_v2 = vpop.xlane.xlu0 %526 }
  0xe8   : > { %v529_v3 = vmul.f32 0.03125, %v527_v2 }
  0xea   : > { %v530_v4 = vsub.f32 %v2370_v0, %v529_v3 }
  0xec   : > { %v531_v5 = vmul.f32 %v530_v4, %v530_v4 }
  0xee   : > { %v532_v6 = vsel %vm524_vm0, %v531_v5, 0.0 }
  0xef   : > { %533 = vadd.xlane.f32.xlu0 %v532_v6 }
 0x178   : > { %v534_v12 = vpop.xlane.xlu0 %533 }
 0x179   : > { %v535_v13 = vmul.f32 0.03125, %v534_v12 }
 0x17b   : > { %v536_v14 = vadd.f32 1e-06, %v535_v13 }
 0x17d   : > { %1965 = vrsqrt.f32 %v536_v14 }
 0x18a   : > { %v1966_v15 = vpop.eup %1965 }
 0x18b   : > { %v538_v17 = vmul.f32 %v1966_v15, %v530_v4 }
 0x18d   : > { %v545_v19 = vmul.f32 %v1738_v16, %v538_v17 }
 0x18f   : > { %v552_v20 = vadd.f32 %v1739_v18, %v545_v19 }
 0x191   : > { %1815 = vmatmul.mubr.msk.f32.vlgmr.msra.gmra.mxu1 %vm524_vm0, %v552_v20 }
 0x192   : > { %1819 = vmatprep.mubr.msk.f32.mxu1 %vm2116_vm1, %v2115_v8 }
 0x251   : > { %v633_v22 = vpop.f32.mrf.mxu1 }
 0x252   : > { %v2410_v23 = vadd.f32 %v1740_v21, %v633_v22 }
 0x253   : > { %v1816_v24 = vpop.f32.mrf.mxu1 }
 0x254   : > { %804 = vrot.lane.b32.xlu0 %v2410_v23, %s2117_s24  ;;  %638 = vrot.lane.b32.xlu1 %v2410_v23, %s2118_s29  ;;  %s1621_s24 = scalar_lea.sflag [#allocation4], %s2353_s22 }
 0x258   : > { %806 = vrot.lane.b32.xlu1 %v2410_v23, %s2119_s28 }
 0x25c   : > { %973 = vrot.lane.b32.xlu1 %v2410_v23, %s2120_s18 }
 0x260   : > { %971 = vrot.lane.b32.xlu1 %v2410_v23, %s2121_s27  ;;  %s2643_s27 = sld [smem:[#allocation17_spill]] }
 0x264   : > { %1140 = vrot.lane.b32.xlu1 %v2410_v23, %s2122_s19  ;;  %s1763_s19 = sshll.u32 %s2228_s17, 7  ;;  %s2131_s17 = smov [#allocation7]  }
 0x268   : > { %1138 = vrot.lane.b32.xlu1 %v2410_v23, %s2123_s0  ;;  %s2128_s0 = smov 8  }
 0x2c6   : > { %v639_v25 = vpop.permute.xlu1 %638  ;;  %v805_v27 = vpop.permute.xlu0 %804 }
 0x2c7   : > { %1818 = vmatpush3.xpose.msk.msra.mxu1 %vm640_vm2, %v639_v25 }
 0x2c8   : > { %1822 = vmatprep.subr.mxu1 %v2115_v8 }
 0x2ca   : > { %1820 = vmatmul.mubr.msk.f32.vlgmr.msra.gmra.mxu1 %vm640_vm2, %v2410_v23  ;;  %v807_v26 = vpop.permute.xlu1 %806 }
 0x2cb   : > { %1828 = vmatpush3.xpose.msk.msra.mxu0 %vm640_vm2, %v807_v26  ;;  %1824 = vmatprep.mubr.msk.f32.mxu1 %vm2116_vm1, %v2115_v8 }
 0x2cc   : > { %1837 = vmatprep.subr.mxu0 %v2115_v8 }
 0x2ce   : > { %1830 = vmatmul.mubr.msk.f32.vlgmr.msra.gmra.mxu0 %vm640_vm2, %v805_v27  ;;  %v974_v28 = vpop.permute.xlu1 %973  ;;  %v1325_v27 = vld [vmem:[%s2603_s6 + $0x18] sm:$0xff] }
 0x2cf   : > { %1838 = vmatpush3.xpose.msk.msra.mxu0 %vm640_vm2, %v974_v28  ;;  %1839 = vmatprep.mubr.msk.f32.mxu0 %vm2116_vm1, %v2115_v8  ;;  %v1324_v28 = vld [vmem:[%s2603_s6 + $0x10] sm:$0xff] }
 0x2d0   : > { %1847 = vmatprep.subr.mxu0 %v2115_v8 }
 0x2d2   : > { %v972_v29 = vpop.permute.xlu1 %971 }
 0x2d3   : > { %1840 = vmatmul.mubr.msk.f32.vlgmr.msra.gmra.mxu0 %vm640_vm2, %v972_v29 }
 0x2d4   : > { %1849 = vmatprep.mubr.msk.f32.mxu0 %vm2116_vm1, %v2115_v8 }
 0x2d6   : > { %v1141_v30 = vpop.permute.xlu1 %1140 }
 0x2d7   : > { %1848 = vmatpush3.xpose.msk.msra.mxu0 %vm640_vm2, %v1141_v30  ;;  %v1323_v30 = vld [vmem:[%s2603_s6 + $0x8] sm:$0xff] }
 0x2d8   : > { %1857 = vmatprep.subr.mxu0 %v2115_v8 }
 0x2da   : > { %v1139_v31 = vpop.permute.xlu1 %1138 }
 0x2db   : > { %1850 = vmatmul.mubr.msk.f32.vlgmr.msra.gmra.mxu0 %vm640_vm2, %v1139_v31 }
 0x2dc   : > { %1865 = vmatprep.mubr.msk.f32.mxu0 %vm2116_vm1, %v2115_v8  ;;  %1858 = vmatpush3.msra.mxu0 %v1325_v27 }
 0x2dd   : > { %1859 = vmatprep.subr.mxu0 %v2115_v8 }
 0x2de   : > { %1860 = vmatpush3.msra.mxu0 %v1324_v28 }
 0x2df   : > { %1861 = vmatprep.subr.mxu0 %v2115_v8 }
 0x2e0   : > { %1862 = vmatpush3.msra.mxu0 %v1323_v30 }
 0x2e1   : > { %1863 = vmatprep.subr.mxu0 %v2115_v8 }
 0x38a   : > { %v711_v32 = vpop.f32.mrf.mxu1 }
 0x38b   : > { %v715_v34 = vmul.f32 0.35355338, %v711_v32  ;;  %v1322_v32 = vld [vmem:[%s2603_s6] sm:$0xff] }
 0x38c   : > { %v1821_v35 = vpop.f32.mrf.mxu1  ;;  %1864 = vmatpush3.msra.mxu0 %v1322_v32 }
 0x38d   : > { %v716_v36 = vadd.f32 %v715_v34, %v521_v33  ;;  %1879 = vmatprep.subr.mxu0 %v2115_v8 }
 0x38e   : > { %v878_v37 = vpop.f32.mrf.mxu0 }
 0x38f   : > { %v882_v38 = vmul.f32 0.35355338, %v878_v37  ;;  %v717_v39 = vsel %vm640_vm2, %v716_v36, -inf }
 0x390   : > { %v1831_v40 = vpop.f32.mrf.mxu0  ;;  %718 = vmax.xlane.f32.xlu1 %v717_v39 }
 0x391   : > { %v883_v41 = vadd.f32 %v882_v38, %v521_v33 }
 0x393   : > { %v1045_v42 = vpop.f32.mrf.mxu0  ;;  %v884_v43 = vsel %vm640_vm2, %v883_v41, -inf }
 0x394   : > { %v1049_v44 = vmul.f32 0.35355338, %v1045_v42  ;;  %885 = vmax.xlane.f32.xlu0 %v884_v43 }
 0x395   : > { %v1841_v45 = vpop.f32.mrf.mxu0 }
 0x396   : > { %v1050_v46 = vadd.f32 %v1049_v44, %v521_v33  ;;  %v1754_v45 = vld [vmem:[%s2604_s7] ss:$0 sm:$0xff] }
 0x398   : > { %v1051_v47 = vsel %vm640_vm2, %v1050_v46, -inf }
 0x399   : > { %1052 = vmax.xlane.f32.xlu1 %v1051_v47 }
 0x39b   : > { %v1212_v48 = vpop.f32.mrf.mxu0 }
 0x39c   : > { %v1216_v49 = vmul.f32 0.35355338, %v1212_v48 }
 0x39d   : > { %v1851_v50 = vpop.f32.mrf.mxu0 }
 0x39e   : > { %v1217_v51 = vadd.f32 %v1216_v49, %v521_v33 }
 0x3a0   : > { %v1218_v52 = vsel %vm640_vm2, %v1217_v51, -inf }
 0x3a1   : > { %1219 = vmax.xlane.f32.xlu0 %v1218_v52 }
 0x3aa   : > { %728 = vrot.lane.b32.xlu1 %v2410_v23, %s2124_s26  ;;  %s2129_s26 = smov 16  }
 0x419   : > { %v719_v53 = vpop.xlane.xlu1 %718 }
 0x41a   : > { %v720_v54 = vsub.f32 %v716_v36, %v719_v53 }
 0x41c   : > { %v721_v55 = vmul.f32 1.442695, %v720_v54 }
 0x41d   : > { %v886_v56 = vpop.xlane.xlu0 %885 }
 0x41e   : > { %1967 = vpow2.f32 %v721_v55  ;;  %v887_v57 = vsub.f32 %v883_v41, %v886_v56  ;;  %v1439_v56 = vld [vmem:[%s2607_s10 + $0x18] sm:$0xff] }
 0x420   : > { %v888_v58 = vmul.f32 1.442695, %v887_v57  ;;  %v1437_v57 = vld [vmem:[%s2607_s10 + $0x8] sm:$0xff] }
 0x422   : > { %1969 = vpow2.f32 %v888_v58  ;;  %v1053_v59 = vpop.xlane.xlu1 %1052  ;;  %v1436_v58 = vld [vmem:[%s2607_s10] sm:$0xff] }
 0x423   : > { %v1054_v60 = vsub.f32 %v1050_v46, %v1053_v59 }
 0x425   : > { %v1055_v61 = vmul.f32 1.442695, %v1054_v60 }
 0x426   : > { %v729_v62 = vpop.permute.xlu1 %728 }
 0x427   : > { %1971 = vpow2.f32 %v1055_v61  ;;  %1823 = vmatpush3.msra.mxu1 %v729_v62 }
 0x428   : > { %1832 = vmatprep.subr.mxu1 %v2115_v8 }
 0x42a   : > { %v1220_v63 = vpop.xlane.xlu0 %1219 }
 0x42b   : > { %v1968_v1 = vpop.eup %1967  ;;  %v1221_v2 = vsub.f32 %v1217_v51, %v1220_v63  ;;  %v1756_v63 = vld [vmem:[%s2605_s8] ss:$0 sm:$0xff] }
 0x42c   : > { %v723_v3 = vsel %vm640_vm2, %v1968_v1, 0.0 }
 0x42d   : > { %v1222_v4 = vmul.f32 1.442695, %v1221_v2  ;;  %724 = vadd.xlane.f32.xlu1 %v723_v3  ;;  %v1757_v2 = vld [vmem:[%s2606_s9] ss:$0 sm:$0xff] }
 0x42f   : > { %v1970_v5 = vpop.eup %1969  ;;  %1973 = vpow2.f32 %v1222_v4 }
 0x430   : > { %v890_v6 = vsel %vm640_vm2, %v1970_v5, 0.0 }
 0x431   : > { %891 = vadd.xlane.f32.xlu0 %v890_v6  ;;  %v1535_v6 = vld [vmem:[%s2609_s12 + $0x30] sm:$0xff] }
 0x434   : > { %v1972_v7 = vpop.eup %1971 }
 0x435   : > { %v1057_v9 = vsel %vm640_vm2, %v1972_v7, 0.0 }
 0x436   : > { %1058 = vadd.xlane.f32.xlu1 %v1057_v9  ;;  %v1533_v9 = vld [vmem:[%s2609_s12 + $0x20] sm:$0xff] }
 0x43c   : > { %v1974_v10 = vpop.eup %1973 }
 0x43d   : > { %v1224_v11 = vsel %vm640_vm2, %v1974_v10, 0.0 }
 0x43e   : > { %1225 = vadd.xlane.f32.xlu0 %v1224_v11  ;;  %v1531_v11 = vld [vmem:[%s2609_s12 + $0x10] sm:$0xff] }
 0x447   : > { %1062 = vrot.lane.b32.xlu1 %v2410_v23, %s2125_s14  ;;  %s2130_s14 = smov 24  }
 0x44b   : > { %1229 = vrot.lane.b32.xlu1 %v2410_v23, %s2126_s13 }
 0x454   : > { %895 = vrot.lane.b32.xlu0 %v2410_v23, %s2127_s15  ;;  %s2644_s15 = sld [smem:[#allocation18_spill]] }
 0x45a   : > { %s2645_s20 = smov %s2644_s15  ;;  %s1632_s23 = scalar_lea.hbm %s2644_s15, %s1763_s19 }
 0x4b6   : > { %v725_v12 = vpop.xlane.xlu1 %724 }
 0x4b7   : > { %1975 = vrcp.f32 %v725_v12  ;;  %v1530_v12 = vld [vmem:[%s2609_s12 + $0x8] sm:$0xff] }
 0x4ba   : > { %v892_v13 = vpop.xlane.xlu0 %891 }
 0x4bb   : > { %1977 = vrcp.f32 %v892_v13  ;;  %v1529_v13 = vld [vmem:[%s2609_s12] sm:$0xff] }
 0x4bf   : > { %v1059_v14 = vpop.xlane.xlu1 %1058 }
 0x4c0   : > { %1979 = vrcp.f32 %v1059_v14  ;;  %v1758_v14 = vld [vmem:[%s2608_s11] ss:$0 sm:$0xff] }
 0x4c3   : > { %v1063_v19 = vpop.permute.xlu1 %1062 }
 0x4c4   : > { %v1976_v15 = vpop.eup %1975 }
 0x4c5   : > { %v727_v16 = vmul.f32 %v1976_v15, %v1968_v1 }
 0x4c7   : > { %v1226_v17 = vpop.xlane.xlu0 %1225  ;;  %1825 = vmatmul.mubr.msk.f32.vlgmr.msra.gmra.mxu1 %vm640_vm2, %v727_v16  ;;  %v1230_v24 = vpop.permute.xlu1 %1229 }
 0x4c8   : > { %v1978_v18 = vpop.eup %1977  ;;  %1981 = vrcp.f32 %v1226_v17  ;;  %1834 = vmatprep.mubr.msk.f32.mxu1 %vm2116_vm1, %v2115_v8 }
 0x4c9   : > { %v894_v21 = vmul.f32 %v1978_v18, %v1970_v5  ;;  %v1536_v5 = vld [vmem:[%s2609_s12 + $0x38] sm:$0xff] }
 0x4cb   : > { %v896_v20 = vpop.permute.xlu0 %895 }
 0x4cc   : > { %1833 = vmatpush3.msra.mxu1 %v896_v20 }
 0x4cd   : > { %v1980_v22 = vpop.eup %1979  ;;  %1835 = vmatmul.mubr.msk.f32.vlgmr.msra.gmra.mxu1 %vm640_vm2, %v894_v21  ;;  %1842 = vmatprep.subr.mxu1 %v2115_v8 }
 0x4ce   : > { %1843 = vmatpush3.msra.mxu1 %v1063_v19  ;;  %1844 = vmatprep.mubr.msk.f32.mxu1 %vm2116_vm1, %v2115_v8  ;;  %v1061_v23 = vmul.f32 %v1980_v22, %v1972_v7  ;;  %v1534_v7 = vld [vmem:[%s2609_s12 + $0x28] sm:$0xff] }
 0x4cf   : > { %1852 = vmatprep.subr.mxu1 %v2115_v8 }
 0x4d1   : > { %1845 = vmatmul.mubr.msk.f32.vlgmr.msra.gmra.mxu1 %vm640_vm2, %v1061_v23 }
 0x4d2   : > { %1853 = vmatpush3.msra.mxu1 %v1230_v24  ;;  %1854 = vmatprep.mubr.msk.f32.mxu1 %vm2116_vm1, %v2115_v8 }
 0x4d3   : > { %1868 = vmatprep.subr.mxu1 %v2115_v8 }
 0x4d5   : > { %v1982_v25 = vpop.eup %1981 }
 0x4d6   : > { %v1228_v26 = vmul.f32 %v1982_v25, %v1974_v10  ;;  %v1532_v10 = vld [vmem:[%s2609_s12 + $0x18] sm:$0xff] }
 0x4d8   : > { %1855 = vmatmul.mubr.msk.f32.vlgmr.msra.gmra.mxu1 %vm640_vm2, %v1228_v26  ;;  %v1760_v26 = vld [vmem:[%s2643_s27] ss:$0 sm:$0xff] }
 0x4d9   : > { %1876 = vmatprep.mubr.msk.f32.mxu1 %vm2116_vm1, %v2115_v8  ;;  %1869 = vmatpush3.msra.mxu1 %v1439_v56 }
 0x4da   : > { %1870 = vmatprep.subr.mxu1 %v2115_v8 }
 0x587   : > { %v800_v29 = vpop.f32.mrf.mxu1 }
 0x589   : > { %v1826_v31 = vpop.f32.mrf.mxu1 }
 0x58d   : > { %v967_v33 = vpop.f32.mrf.mxu1 }
 0x58e   : > { %1306 = vrot.lane.b32.xlu0 %v967_v33, %s2128_s0  ;;  %s519_s0 = scalar_lea.vmem [#allocation7], %s2356_s21  ;;  %s2047_s21 = sshll.u32 %s2131_s17, 4  ;;  %s2048_s21 = int_to_ptr.vmem [resolvable:$false] %s2047_s21 }
 0x58f   : > { %v1836_v34 = vpop.f32.mrf.mxu1  ;;  %s2049_s28 = scalar_lea.vmem %s2048_s21, 256 }
 0x591   : > { %v1134_v35 = vpop.f32.mrf.mxu1 }
 0x592   : > { %1310 = vrot.lane.b32.xlu1 %v1134_v35, %s2129_s26  ;;  %s1634_s26 = sshll.u32 %s519_s0, 4  ;;  %s1635_s26 = int_to_ptr.vmem [resolvable:$true] %s1634_s26 }
 0x593   : > { %v1846_v36 = vpop.f32.mrf.mxu1  ;;  %s2043_s29 = scalar_lea.vmem %s1635_s26, 128  ;;  %p2050_p10 = scmp.lt.s32.totalorder %s1635_s26, %s2048_s21 }
 0x594   : > { %p2044_p13 = scmp.ne.s32.totalorder %s1635_s26, %s2043_s29  ;;  %p2051_p2 = scmp.lt.s32.totalorder %s2049_s28, %s2043_s29 }
 0x596   : > { %p2045_p7 = pnand %p2044_p13, %p2646_p3  ;;  %p2052_p4 = por %p2051_p2, %p2050_p10 }
 0x598   : > { %v1301_v37 = vpop.f32.mrf.mxu1  ;;  %p2046_p8 = pneg %p2045_p7 }
 0x599   : > { %1314 = vrot.lane.b32.xlu0 %v1301_v37, %s2130_s14 }
 0x59a   : > { %v1856_v38 = vpop.f32.mrf.mxu1  ;;  %p2053_p5 = pnand %p2052_p4, %p2046_p8 }
 0x600   : > { %v1307_v39 = vpop.permute.xlu0 %1306 }
 0x601   : > { %v1317_v41 = vsel %vm640_vm2, %v800_v29, %v1307_v39 }
 0x604   : > { %v1311_v40 = vpop.permute.xlu1 %1310 }
 0x605   : > { %v1319_v42 = vsel %vm1318_vm3, %v1317_v41, %v1311_v40 }
 0x60b   : > { %v1315_v43 = vpop.permute.xlu0 %1314 }
 0x60c   : > { %v1321_v44 = vsel %vm1320_vm4, %v1319_v42, %v1315_v43 }
 0x60d   : > { %1866 = vmatmul.mubr.msk.f32.vlgmr.msra.gmra.mxu0 %vm524_vm0, %v1321_v44 }
 0x60e   : > { %1895 = vmatprep.mubr.msk.f32.mxu0 %vm2116_vm1, %v2115_v8  ;;  %1880 = vmatpush3.msra.mxu0 %v1536_v5 }
 0x60f   : > { %1881 = vmatprep.subr.mxu0 %v2115_v8 }
 0x610   : > { %1882 = vmatpush3.msra.mxu0 %v1535_v6 }
 0x611   : > { %1883 = vmatprep.subr.mxu0 %v2115_v8 }
 0x612   : > { %1884 = vmatpush3.msra.mxu0 %v1534_v7 }
 0x613   : > { %1885 = vmatprep.subr.mxu0 %v2115_v8 }
 0x614   : > { %1886 = vmatpush3.msra.mxu0 %v1533_v9 }
 0x615   : > { %1887 = vmatprep.subr.mxu0 %v2115_v8 }
 0x616   : > { %1888 = vmatpush3.msra.mxu0 %v1532_v10 }
 0x617   : > { %1889 = vmatprep.subr.mxu0 %v2115_v8 }
 0x618   : > { %1890 = vmatpush3.msra.mxu0 %v1531_v11 }
 0x619   : > { %1891 = vmatprep.subr.mxu0 %v2115_v8 }
 0x61a   : > { %1892 = vmatpush3.msra.mxu0 %v1530_v12 }
 0x61b   : > { %1893 = vmatprep.subr.mxu0 %v2115_v8 }
 0x61c   : > { %1894 = vmatpush3.msra.mxu0 %v1529_v13 }
 0x6cd   : > { %v1402_v46 = vpop.f32.mrf.mxu0 }
 0x6ce   : > { %v1403_v47 = vadd.f32 %v1754_v45, %v1402_v46 }
 0x6cf   : > { %v1867_v48 = vpop.f32.mrf.mxu0 }
 0x6d0   : > { %v2494_v49 = vadd.f32 %v1403_v47, %v2370_v0  ;;  %v1438_v0 = vld [vmem:[%s2607_s10 + $0x10] sm:$0xff] }
 0x6d1   : > { %1871 = vmatpush3.msra.mxu1 %v1438_v0 }
 0x6d2   : > { %v1409_v50 = vsel %vm524_vm0, %v2494_v49, 0.0  ;;  %1872 = vmatprep.subr.mxu1 %v2115_v8 }
 0x6d3   : > { %1410 = vadd.xlane.f32.xlu1 %v1409_v50  ;;  %1873 = vmatpush3.msra.mxu1 %v1437_v57 }
 0x6d4   : > { %1874 = vmatprep.subr.mxu1 %v2115_v8 }
 0x6d5   : > { %1875 = vmatpush3.msra.mxu1 %v1436_v58 }
 0x75c   : > { %v1411_v51 = vpop.xlane.xlu1 %1410 }
 0x75d   : > { %v1412_v52 = vmul.f32 0.03125, %v1411_v51 }
 0x75f   : > { %v1413_v53 = vsub.f32 %v2494_v49, %v1412_v52 }
 0x761   : > { %v1414_v54 = vmul.f32 %v1413_v53, %v1413_v53 }
 0x763   : > { %v1415_v55 = vsel %vm524_vm0, %v1414_v54, 0.0 }
 0x764   : > { %1416 = vadd.xlane.f32.xlu0 %v1415_v55 }
 0x7ed   : > { %v1417_v59 = vpop.xlane.xlu0 %1416 }
 0x7ee   : > { %v1418_v60 = vmul.f32 0.03125, %v1417_v59 }
 0x7f0   : > { %v1419_v61 = vadd.f32 1e-06, %v1418_v60 }
 0x7f2   : > { %1983 = vrsqrt.f32 %v1419_v61 }
 0x7ff   : > { %v1984_v62 = vpop.eup %1983 }
 0x800   : > { %v1421_v1 = vmul.f32 %v1984_v62, %v1413_v53 }
 0x802   : > { %v1428_v3 = vmul.f32 %v1756_v63, %v1421_v1 }
 0x804   : > { %v1435_v4 = vadd.f32 %v1757_v2, %v1428_v3 }
 0x806   : > { %1877 = vmatmul.mubr.msk.f32.vlgmr.msra.gmra.mxu1 %vm524_vm0, %v1435_v4 }
 0x8c6   : > { %v1516_v15 = vpop.f32.mrf.mxu1 }
 0x8c7   : > { %v1517_v16 = vadd.f32 %v1758_v14, %v1516_v15 }
 0x8c8   : > { %v1878_v17 = vpop.f32.mrf.mxu1 }
 0x8c9   : > { %v1521_v18 = vmul.f32 0.044715, %v1517_v16  ;;  %v1520_v24 = vmul.f32 0.5, %v1517_v16 }
 0x8cb   : > { %v1522_v19 = vmul.f32 %v1521_v18, %v1517_v16 }
 0x8cd   : > { %v1523_v20 = vmul.f32 %v1522_v19, %v1517_v16 }
 0x8cf   : > { %v1524_v21 = vadd.f32 %v1523_v20, %v1517_v16 }
 0x8d1   : > { %v1525_v22 = vmul.f32 0.7978846, %v1524_v21 }
 0x8d3   : > { %1985 = vtanh.f32 %v1525_v22 }
 0x8e0   : > { %v1986_v23 = vpop.eup %1985 }
 0x8e1   : > { %v1527_v8 = vadd.f32 1.0, %v1986_v23 }
 0x8e3   : > { %v1528_v25 = vmul.f32 %v1527_v8, %v1520_v24 }
 0x8e5   : > { %1896 = vmatmul.mubr.msk.f32.vlgmr.msra.gmra.mxu0 %vm1544_vm5, %v1528_v25 }
 0x9a5   : > { %v1614_v27 = vpop.f32.mrf.mxu0 }
 0x9a6   : > { %v1615_v28 = vadd.f32 %v1760_v26, %v1614_v27 }
 0x9a7   : > { %v1897_v29 = vpop.f32.mrf.mxu0 }
 0x9a8   : > { %v1618_v30 = vadd.f32 %v1615_v28, %v2494_v49 }
 0x9aa   : > { %1619 = vst.msk [vmem:[%s519_s0] sm:$0xff] %vm524_vm0, %v1618_v30 }
 0x9ab   : > { %2056 = shalt.err (!%p2053_p5)
}
 0x9ac   : > { %s2057_s18 = scalar_lea.hbm %s1632_s23, 128  ;;  %s2061_s19 = scalar_lea.hbm %s2645_s20, 256 }
 0x9ad   : > { %p2058_p9 = scmp.ne.s32.totalorder %s1632_s23, %s2057_s18  ;;  %p2062_p12 = scmp.lt.s32.totalorder %s1632_s23, %s2645_s20 }
 0x9ae   : > { %p2063_p1 = scmp.lt.s32.totalorder %s2061_s19, %s2057_s18 }
 0x9af   : > { %p2059_p0 = pnand %p2058_p9, %p2646_p3 }
 0x9b0   : > { %p2064_p6 = por %p2063_p1, %p2062_p12 }
 0x9b1   : > { %p2060_p11 = pneg %p2059_p0 }
 0x9b3   : > { %p2065_p13 = pnand %p2064_p6, %p2060_p11 }
 0x9b5   : > { %2068 = shalt.err (!%p2065_p13)
}
 0x9b6   : > { %1902 = dma.vmem_to_hbm [thread:$0]  (%p2646_p3), %s1635_s26, 128, %s1632_s23, %s1621_s24  }
 0x9b7 PF: > { %s2647_s13 = sld [smem:[#allocation11_spill]]  ;;  %p2650_p8 = scmp.ge.s32.totalorder %s2111_s16, 2 }
 0x9b8   : > { %s2648_s15 = sld [smem:[#allocation15_spill]] }
 0x9bd   : > { %s1646_s29 = sand.u32 1, %s2647_s13  }
 0x9be   : > { %p2649_p7 = scmp.ne.s32.totalorder %s2648_s15, 0  ;;  %s1647_s17 = scalar_lea.sflag [#allocation4], %s1646_s29 }
 0x9c0   : > { %p1912_p10 = pnand %p2650_p8, %p2649_p7 }
 0x9c2   : > { %p1913_p2 = pneg %p1912_p10 }
 0x9c4   : > { %2094 = dma.done.wait (%p1913_p2), %s1647_s17, 128  }
 0x9c5   : > { %2096 = vsyncadd (%p1913_p2), %s1647_s17, 4294967168  ;;  %s2651_s16 = sld [smem:[#allocation13_spill]]  ;;  %s2654_s29 = smov %s2103_s30 }
 0x9c6   : > { %s2652_s21 = sld [smem:[#allocation12_spill]] }
 0x9c7   : > { %s2653_s15 = sld [smem:[#allocation14_spill]] }
 0x9cb   : > { %p30_p4 = scmp.ge.s32.totalorder %s2651_s16, 4  }
 0x9cc   : > { %s2655_s30 = smov %s2652_s21 }
 0x9cd   :  { %32 = sbr.rel (!%p30_p4) target bundleno = 11 (0xb), region = 134 }
 0x9d2   :  { %1652 = vsyncpa [#allocation3], 1 }
 0x9d3   :  { %1654 = vsyncpa [#allocation3 + $0x1], 1 }
 0x9d4   :  { %1655 = vsyncpa [#allocation6], 1 }
 0x9d5   :  { %1657 = vsyncpa [#allocation6 + $0x1], 1 }
 0x9d6   :  { %1658 = vsyncpa [#allocation4], 1 }
 0x9d7   :  { %1660 = vsyncpa [#allocation4 + $0x1], 1 }

</bundles_post_ra>
